<compile_context>
chip_gen: v5e
topology: v5e:2x2
jax: 0.10.0
libtpu: 0.0.40
codegen_flags: <defaults>
</compile_context>

<pallas_src>
import functools

import jax
import jax.numpy as jnp
from jax.experimental import pallas as pl
from jax.experimental.pallas import tpu as pltpu

_LANE = 128  # TPU lane width — last dims are padded to this for dense stores.


def _round_up(x, m):
    return (x + m - 1) // m * m


def _attn_decoder_kernel(q_ref, k_ref, v_ref, wo_ref, bo_ref,
                         out_ref, attn_ref, *,
                         d_model: int, tk_valid: int, approx_recip: bool):
    bs, tq, d_pad = q_ref.shape
    tk_pad = k_ref.shape[1]
    v_pad = wo_ref.shape[1]

    q = q_ref[...]          # (BS, Tq,     Dpad)  compute dtype
    k = k_ref[...]          # (BS, Tk_pad, Dpad)
    val = v_ref[...]        # (BS, Tk_pad, Dpad)

    # Batched QK^T on the MXU, f32 accumulation. Zero-padded D columns
    # contribute nothing to the contraction.
    scores = jnp.einsum("bqd,bkd->bqk", q, k,
                        preferred_element_type=jnp.float32)
    # 1/sqrt(D) as an f32 constant on the f32 scores (keeps elementwise math
    # off the bf16 VPU path; D is the real model dim, not the padded one).
    scores = scores * jnp.float32(1.0 / (d_model ** 0.5))

    # Mask the (static) Tk padding before the softmax.
    # TODO(synk): dynamic valid_lens would come in via scalar prefetch (SMEM).
    if tk_valid < tk_pad:
        key_idx = jax.lax.broadcasted_iota(jnp.int32, scores.shape, 2)
        scores = jnp.where(key_idx < tk_valid, scores, jnp.float32(-1e30))

    # Numerically-stable softmax over the key axis (VPU + EUP).
    m = scores.max(axis=-1, keepdims=True)
    p = jnp.exp(scores - m)
    denom = p.sum(axis=-1, keepdims=True)
    attn = p * pl.reciprocal(denom, approx=approx_recip)   # f32; pads are 0

    # Context: batched PV matmul in compute dtype, f32 accumulation. Padded
    # keys have attention weight exactly 0 so they contribute nothing.
    attn_c = attn.astype(val.dtype)
    ctx = jnp.einsum("bqk,bkd->bqd", attn_c, val,
                     preferred_element_type=jnp.float32)

    # Output projection hoisted across the batch: one (BS*Tq, Dpad)@(Dpad, Vpad)
    # matmul sharing W_o. With Dpad a multiple of 128 and Tq a multiple of 8
    # this reshape is layout-free (no VMEM relayout copy each grid step).
    ctx2d = ctx.astype(wo_ref.dtype).reshape(bs * tq, d_pad)
    out2d = jnp.dot(ctx2d, wo_ref[...],
                    preferred_element_type=jnp.float32) + bo_ref[...]

    out_ref[...] = out2d.reshape(bs, tq, v_pad).astype(out_ref.dtype)
    attn_ref[...] = attn_c.astype(attn_ref.dtype)


def attention_decoder_step(q, k, v, w_o, b_o, *, block_b=None,
                           compute_dtype=jnp.bfloat16):
    """Fused attention-decoder step. Returns (output, attention_weights)."""
    B, Tq, D = q.shape
    _, Tk, _ = k.shape
    V = w_o.shape[1]

    # Lane-dense blocks: pad D (contraction / lane dim of Q,K,V,W_o), the key
    # axis (attention-weight lanes) and the projection output axis to 128.
    D_pad = _round_up(max(D, _LANE), _LANE)
    Tk_pad = _round_up(max(Tk, _LANE), _LANE)
    V_pad = _round_up(max(V, _LANE), _LANE)

    # Default: >=2 grid steps when the batch allows it so the "parallel"
    # batch axis shards across v7x's two TensorCores (harmless on v5e/v6e).
    if block_b is None:
        block_b = B // 2 if (B % 2 == 0 and B >= 2) else B
    assert B % block_b == 0, "block_b must divide the batch size"
    grid = (B // block_b,)

    qc = jnp.pad(q, ((0, 0), (0, 0), (0, D_pad - D))).astype(compute_dtype)
    kc = jnp.pad(k, ((0, 0), (0, Tk_pad - Tk), (0, D_pad - D))).astype(compute_dtype)
    vc = jnp.pad(v, ((0, 0), (0, Tk_pad - Tk), (0, D_pad - D))).astype(compute_dtype)
    wc = jnp.pad(w_o, ((0, D_pad - D), (0, V_pad - V))).astype(compute_dtype)
    bc = jnp.pad(b_o.reshape(1, V), ((0, 0), (0, V_pad - V))).astype(jnp.float32)

    # Attention weights written back in bf16 on the fast path (halves the
    # (B,Tq,Tk) HBM writeback); exact f32 on the check path.
    attn_dtype = jnp.float32 if compute_dtype == jnp.float32 else jnp.bfloat16

    kernel = functools.partial(
        _attn_decoder_kernel,
        d_model=D,
        tk_valid=Tk,
        approx_recip=(compute_dtype != jnp.float32))

    def run(single_buffer_consts: bool):
        const_kwargs = {}
        if single_buffer_consts:
            # Grid-invariant W_o / b_o: no need for double-buffering.
            const_kwargs = dict(pipeline_mode=pl.Buffered(1))
        in_specs = [
            pl.BlockSpec((block_b, Tq, D_pad), lambda b: (b, 0, 0)),     # Q
            pl.BlockSpec((block_b, Tk_pad, D_pad), lambda b: (b, 0, 0)),  # K
            pl.BlockSpec((block_b, Tk_pad, D_pad), lambda b: (b, 0, 0)),  # V
            pl.BlockSpec((D_pad, V_pad), lambda b: (0, 0), **const_kwargs),  # W_o
            pl.BlockSpec((1, V_pad), lambda b: (0, 0), **const_kwargs),      # b_o
        ]
        out_specs = [
            pl.BlockSpec((block_b, Tq, V_pad), lambda b: (b, 0, 0)),     # out
            pl.BlockSpec((block_b, Tq, Tk_pad), lambda b: (b, 0, 0)),    # attn
        ]
        grid_spec = pltpu.PrefetchScalarGridSpec(
            num_scalar_prefetch=0,
            grid=grid,
            in_specs=in_specs,
            out_specs=out_specs)
        return pl.pallas_call(
            kernel,
            out_shape=(
                jax.ShapeDtypeStruct((B, Tq, V_pad), jnp.float32),
                jax.ShapeDtypeStruct((B, Tq, Tk_pad), attn_dtype),
            ),
            grid_spec=grid_spec,
            compiler_params=pltpu.CompilerParams(
                dimension_semantics=("parallel",),
                vmem_limit_bytes=48 * 1024 * 1024),
        )(qc, kc, vc, wc, bc)

    try:
        out_pad, attn_pad = run(True)
    except Exception:
        # Older jax without BlockSpec pipeline_mode / Buffered(1) support.
        out_pad, attn_pad = run(False)

    # Strip the lane padding back off.
    out = out_pad[:, :, :V]
    attn = attn_pad[:, :, :Tk].astype(jnp.float32)
    return out, attn


def _reference(q, k, v, w_o, b_o):
    d = q.shape[-1]
    scores = jnp.einsum("bqd,bkd->bqk", q, k) / jnp.sqrt(jnp.float32(d))
    attn = jax.nn.softmax(scores, axis=-1)
    ctx = jnp.einsum("bqk,bkd->bqd", attn, v)
    out = jnp.einsum("bqd,dv->bqv", ctx, w_o) + b_o
    return out, attn


if __name__ == "__main__":
    # Small, deterministic shapes consistent with an attention-decoder step.
    B, Tq, Tk, D, V = 2, 8, 8, 32, 32

    key = jax.random.PRNGKey(0)
    kq, kk, kv, kw, kb = jax.random.split(key, 5)

    q = jax.random.normal(kq, (B, Tq, D), dtype=jnp.float32)
    k = jax.random.normal(kk, (B, Tk, D), dtype=jnp.float32)
    v = jax.random.normal(kv, (B, Tk, D), dtype=jnp.float32)
    # Deterministic parameter init (synthetic; no checkpoint load).
    w_o = jax.random.normal(kw, (D, V), dtype=jnp.float32) * (1.0 / jnp.sqrt(D))
    b_o = jax.random.normal(kb, (1, V), dtype=jnp.float32) * 0.01

    ref_out, ref_attn = _reference(q, k, v, w_o, b_o)

    # Fast path: bf16 MXU inputs, f32 accumulation, approx reciprocal (EUP),
    # bf16 attention-weight writeback.
    out, attn = attention_decoder_step(q, k, v, w_o, b_o)
    out = jax.block_until_ready(out)
    attn = jax.block_until_ready(attn)
    assert out.shape == (B, Tq, V) and attn.shape == (B, Tq, Tk)
    assert jnp.allclose(out, ref_out, atol=1e-1, rtol=1e-1)
    assert jnp.allclose(attn, ref_attn, atol=5e-2, rtol=5e-2)

    # f32 path (exact reciprocal, f32 weights) for a tight numerical check.
    out32, attn32 = attention_decoder_step(q, k, v, w_o, b_o,
                                           compute_dtype=jnp.float32)
    out32 = jax.block_until_ready(out32)
    attn32 = jax.block_until_ready(attn32)
    assert jnp.allclose(out32, ref_out, atol=1e-4, rtol=1e-4)
    assert jnp.allclose(attn32, ref_attn, atol=1e-5, rtol=1e-5)

    print("KERNEL_OK")
</pallas_src>

<mosaic_0001>
module attributes {stable_mosaic.version = 11 : i64} {
  func.func @_attn_decoder_kernel(%arg0: i32, %arg1: memref<1x8x128xbf16, #tpu.memory_space<vmem>>, %arg2: memref<1x128x128xbf16, #tpu.memory_space<vmem>>, %arg3: memref<1x128x128xbf16, #tpu.memory_space<vmem>>, %arg4: memref<128x128xbf16, #tpu.memory_space<vmem>>, %arg5: memref<1x128xf32, #tpu.memory_space<vmem>>, %arg6: memref<1x8x128xf32, #tpu.memory_space<vmem>>, %arg7: memref<1x8x128xbf16, #tpu.memory_space<vmem>>) attributes {dimension_semantics = [#tpu.dimension_semantics<parallel>], iteration_bounds = array<i64: 2>, scalar_prefetch = 0 : i64, scratch_operands = 0 : i64, tpu.core_type = #tpu.core_type<tc>, window_params = [{transform_indices = @transform_0, window_bounds = array<i64: 1, 8, 128>}, {transform_indices = @transform_1, window_bounds = array<i64: 1, 128, 128>}, {transform_indices = @transform_2, window_bounds = array<i64: 1, 128, 128>}, {pipeline_mode = #tpu.pipeline_mode<synchronous>, transform_indices = @transform_3, window_bounds = array<i64: 128, 128>}, {pipeline_mode = #tpu.pipeline_mode<synchronous>, transform_indices = @transform_4, window_bounds = array<i64: 1, 128>}, {transform_indices = @transform_5, window_bounds = array<i64: 1, 8, 128>}, {transform_indices = @transform_6, window_bounds = array<i64: 1, 8, 128>}]} {
    %c0 = arith.constant 0 : index
    %c0_0 = arith.constant 0 : index
    %c0_1 = arith.constant 0 : index
    %0 = vector.load %arg1[%c0, %c0_0, %c0_1] : memref<1x8x128xbf16, #tpu.memory_space<vmem>>, vector<1x8x128xbf16>
    %c0_2 = arith.constant 0 : index
    %c0_3 = arith.constant 0 : index
    %c0_4 = arith.constant 0 : index
    %1 = vector.load %arg2[%c0_2, %c0_3, %c0_4] : memref<1x128x128xbf16, #tpu.memory_space<vmem>>, vector<1x128x128xbf16>
    %c0_5 = arith.constant 0 : index
    %c0_6 = arith.constant 0 : index
    %c0_7 = arith.constant 0 : index
    %2 = vector.load %arg3[%c0_5, %c0_6, %c0_7] : memref<1x128x128xbf16, #tpu.memory_space<vmem>>, vector<1x128x128xbf16>
    "tpu.trace_start"() <{level = 10 : i32, message = "bqd,bkd->bqk"}> : () -> ()
    %cst = arith.constant dense<0.000000e+00> : vector<1x8x128xf32>
    %3 = tpu.matmul %0, %1, %cst {dimension_numbers = #tpu.dot_dimension_numbers<[2], [2], [1], [1], [0, 0, 0, 1, 1, 1], [0], [0]>} : vector<1x8x128xbf16>, vector<1x128x128xbf16>, vector<1x8x128xf32> -> vector<1x8x128xf32>
    "tpu.trace_stop"() : () -> ()
    %cst_8 = arith.constant 0.176776692 : f32
    %4 = vector.broadcast %cst_8 : f32 to vector<1x8x128xf32>
    %5 = arith.mulf %3, %4 : vector<1x8x128xf32>
    %6 = tpu.iota {dimensions = array<i32: 2>} : vector<1x8x128xi32>
    %c8_i32 = arith.constant 8 : i32
    %7 = vector.broadcast %c8_i32 : i32 to vector<1x8x128xi32>
    %8 = arith.cmpi slt, %6, %7 : vector<1x8x128xi32>
    %cst_9 = arith.constant -1.000000e+30 : f32
    %9 = vector.broadcast %cst_9 : f32 to vector<1x8x128xf32>
    %10 = arith.select %8, %5, %9 : vector<1x8x128xi1>, vector<1x8x128xf32>
    %cst_10 = arith.constant dense<0xFF800000> : vector<1x8xf32>
    %11 = vector.multi_reduction <maximumf>, %10, %cst_10 [2] : vector<1x8x128xf32> to vector<1x8xf32>
    %12 = vector.shape_cast %11 : vector<1x8xf32> to vector<1x8x1xf32>
    %13 = vector.broadcast %12 : vector<1x8x1xf32> to vector<1x8x128xf32>
    %14 = arith.subf %10, %13 : vector<1x8x128xf32>
    %15 = math.exp %14 : vector<1x8x128xf32>
    %cst_11 = arith.constant dense<0.000000e+00> : vector<1x8xf32>
    %16 = vector.multi_reduction <add>, %15, %cst_11 [2] : vector<1x8x128xf32> to vector<1x8xf32>
    %17 = vector.shape_cast %16 : vector<1x8xf32> to vector<1x8x1xf32>
    %18 = tpu.reciprocal %17 {approx = true} : vector<1x8x1xf32> -> vector<1x8x1xf32>
    %19 = vector.broadcast %18 : vector<1x8x1xf32> to vector<1x8x128xf32>
    %20 = arith.mulf %15, %19 : vector<1x8x128xf32>
    %21 = arith.truncf %20 : vector<1x8x128xf32> to vector<1x8x128xbf16>
    "tpu.trace_start"() <{level = 10 : i32, message = "bqk,bkd->bqd"}> : () -> ()
    %cst_12 = arith.constant dense<0.000000e+00> : vector<1x8x128xf32>
    %22 = tpu.matmul %21, %2, %cst_12 {dimension_numbers = #tpu.dot_dimension_numbers<[2], [1], [1], [2], [0, 0, 0, 1, 1, 2], [0], [0]>} : vector<1x8x128xbf16>, vector<1x128x128xbf16>, vector<1x8x128xf32> -> vector<1x8x128xf32>
    "tpu.trace_stop"() : () -> ()
    %23 = arith.truncf %22 : vector<1x8x128xf32> to vector<1x8x128xbf16>
    %24 = vector.shape_cast %23 : vector<1x8x128xbf16> to vector<8x128xbf16>
    %c0_13 = arith.constant 0 : index
    %c0_14 = arith.constant 0 : index
    %25 = vector.load %arg4[%c0_13, %c0_14] : memref<128x128xbf16, #tpu.memory_space<vmem>>, vector<128x128xbf16>
    %cst_15 = arith.constant dense<0.000000e+00> : vector<8x128xf32>
    %26 = tpu.matmul %24, %25, %cst_15 {dimension_numbers = #tpu.dot_dimension_numbers<[1], [0], [0], [1], [0, 0, 1, 1], [], []>} : vector<8x128xbf16>, vector<128x128xbf16>, vector<8x128xf32> -> vector<8x128xf32>
    %c0_16 = arith.constant 0 : index
    %c0_17 = arith.constant 0 : index
    %27 = vector.load %arg5[%c0_16, %c0_17] : memref<1x128xf32, #tpu.memory_space<vmem>>, vector<1x128xf32>
    %28 = vector.broadcast %27 : vector<1x128xf32> to vector<8x128xf32>
    %29 = arith.addf %26, %28 : vector<8x128xf32>
    %30 = vector.shape_cast %29 : vector<8x128xf32> to vector<1x8x128xf32>
    %c0_18 = arith.constant 0 : index
    %c0_19 = arith.constant 0 : index
    %c0_20 = arith.constant 0 : index
    %31 = vector.load %arg6[%c0_18, %c0_19, %c0_20] : memref<1x8x128xf32, #tpu.memory_space<vmem>>, vector<1x8x128xf32>
    tpu.vector_store %arg6[%c0_18, %c0_19, %c0_20], %30 {strides = array<i32>} : memref<1x8x128xf32, #tpu.memory_space<vmem>>, vector<1x8x128xf32>,
    %c0_21 = arith.constant 0 : index
    %c0_22 = arith.constant 0 : index
    %c0_23 = arith.constant 0 : index
    %32 = vector.load %arg7[%c0_21, %c0_22, %c0_23] : memref<1x8x128xbf16, #tpu.memory_space<vmem>>, vector<1x8x128xbf16>
    tpu.vector_store %arg7[%c0_21, %c0_22, %c0_23], %21 {strides = array<i32>} : memref<1x8x128xbf16, #tpu.memory_space<vmem>>, vector<1x8x128xbf16>,
    return
  }
  func.func @transform_0(%arg0: i32) -> (i32, i32, i32) {
    %c0_i32 = arith.constant 0 : i32
    %c0_i32_0 = arith.constant 0 : i32
    %c0_i32_1 = arith.constant 0 : i32
    return %arg0, %c0_i32, %c0_i32_0 : i32, i32, i32
  }
  func.func @transform_1(%arg0: i32) -> (i32, i32, i32) {
    %c0_i32 = arith.constant 0 : i32
    %c0_i32_0 = arith.constant 0 : i32
    %c0_i32_1 = arith.constant 0 : i32
    return %arg0, %c0_i32, %c0_i32_0 : i32, i32, i32
  }
  func.func @transform_2(%arg0: i32) -> (i32, i32, i32) {
    %c0_i32 = arith.constant 0 : i32
    %c0_i32_0 = arith.constant 0 : i32
    %c0_i32_1 = arith.constant 0 : i32
    return %arg0, %c0_i32, %c0_i32_0 : i32, i32, i32
  }
  func.func @transform_3(%arg0: i32) -> (i32, i32) {
    %c0_i32 = arith.constant 0 : i32
    %c0_i32_0 = arith.constant 0 : i32
    %c0_i32_1 = arith.constant 0 : i32
    return %c0_i32, %c0_i32_0 : i32, i32
  }
  func.func @transform_4(%arg0: i32) -> (i32, i32) {
    %c0_i32 = arith.constant 0 : i32
    %c0_i32_0 = arith.constant 0 : i32
    %c0_i32_1 = arith.constant 0 : i32
    return %c0_i32, %c0_i32_0 : i32, i32
  }
  func.func @transform_5(%arg0: i32) -> (i32, i32, i32) {
    %c0_i32 = arith.constant 0 : i32
    %c0_i32_0 = arith.constant 0 : i32
    %c0_i32_1 = arith.constant 0 : i32
    return %arg0, %c0_i32, %c0_i32_0 : i32, i32, i32
  }
  func.func @transform_6(%arg0: i32) -> (i32, i32, i32) {
    %c0_i32 = arith.constant 0 : i32
    %c0_i32_0 = arith.constant 0 : i32
    %c0_i32_1 = arith.constant 0 : i32
    return %arg0, %c0_i32, %c0_i32_0 : i32, i32, i32
  }
}

module attributes {stable_mosaic.version = 11 : i64} {
  func.func @_attn_decoder_kernel(%arg0: i32, %arg1: memref<1x8x128xbf16, #tpu.memory_space<vmem>>, %arg2: memref<1x128x128xbf16, #tpu.memory_space<vmem>>, %arg3: memref<1x128x128xbf16, #tpu.memory_space<vmem>>, %arg4: memref<128x128xbf16, #tpu.memory_space<vmem>>, %arg5: memref<1x128xf32, #tpu.memory_space<vmem>>, %arg6: memref<1x8x128xf32, #tpu.memory_space<vmem>>, %arg7: memref<1x8x128xbf16, #tpu.memory_space<vmem>>) attributes {dimension_semantics = [#tpu.dimension_semantics<parallel>], iteration_bounds = array<i64: 2>, scalar_prefetch = 0 : i64, scratch_operands = 0 : i64, tpu.core_type = #tpu.core_type<tc>, window_params = [{transform_indices = @transform_0, window_bounds = array<i64: 1, 8, 128>}, {transform_indices = @transform_1, window_bounds = array<i64: 1, 128, 128>}, {transform_indices = @transform_2, window_bounds = array<i64: 1, 128, 128>}, {pipeline_mode = #tpu.pipeline_mode<synchronous>, transform_indices = @transform_3, window_bounds = array<i64: 128, 128>}, {pipeline_mode = #tpu.pipeline_mode<synchronous>, transform_indices = @transform_4, window_bounds = array<i64: 1, 128>}, {transform_indices = @transform_5, window_bounds = array<i64: 1, 8, 128>}, {transform_indices = @transform_6, window_bounds = array<i64: 1, 8, 128>}]} {
    %c0 = arith.constant 0 : index
    %c0_0 = arith.constant 0 : index
    %c0_1 = arith.constant 0 : index
    %0 = vector.load %arg1[%c0, %c0_0, %c0_1] : memref<1x8x128xbf16, #tpu.memory_space<vmem>>, vector<1x8x128xbf16>
    %c0_2 = arith.constant 0 : index
    %c0_3 = arith.constant 0 : index
    %c0_4 = arith.constant 0 : index
    %1 = vector.load %arg2[%c0_2, %c0_3, %c0_4] : memref<1x128x128xbf16, #tpu.memory_space<vmem>>, vector<1x128x128xbf16>
    %c0_5 = arith.constant 0 : index
    %c0_6 = arith.constant 0 : index
    %c0_7 = arith.constant 0 : index
    %2 = vector.load %arg3[%c0_5, %c0_6, %c0_7] : memref<1x128x128xbf16, #tpu.memory_space<vmem>>, vector<1x128x128xbf16>
    "tpu.trace_start"() <{level = 10 : i32, message = "bqd,bkd->bqk"}> : () -> ()
    %cst = arith.constant dense<0.000000e+00> : vector<1x8x128xf32>
    %3 = tpu.matmul %0, %1, %cst {dimension_numbers = #tpu.dot_dimension_numbers<[2], [2], [1], [1], [0, 0, 0, 1, 1, 1], [0], [0]>} : vector<1x8x128xbf16>, vector<1x128x128xbf16>, vector<1x8x128xf32> -> vector<1x8x128xf32>
    "tpu.trace_stop"() : () -> ()
    %cst_8 = arith.constant 0.176776692 : f32
    %4 = vector.broadcast %cst_8 : f32 to vector<1x8x128xf32>
    %5 = arith.mulf %3, %4 : vector<1x8x128xf32>
    %6 = tpu.iota {dimensions = array<i32: 2>} : vector<1x8x128xi32>
    %c8_i32 = arith.constant 8 : i32
    %7 = vector.broadcast %c8_i32 : i32 to vector<1x8x128xi32>
    %8 = arith.cmpi slt, %6, %7 : vector<1x8x128xi32>
    %cst_9 = arith.constant -1.000000e+30 : f32
    %9 = vector.broadcast %cst_9 : f32 to vector<1x8x128xf32>
    %10 = arith.select %8, %5, %9 : vector<1x8x128xi1>, vector<1x8x128xf32>
    %cst_10 = arith.constant dense<0xFF800000> : vector<1x8xf32>
    %11 = vector.multi_reduction <maximumf>, %10, %cst_10 [2] : vector<1x8x128xf32> to vector<1x8xf32>
    %12 = vector.shape_cast %11 : vector<1x8xf32> to vector<1x8x1xf32>
    %13 = vector.broadcast %12 : vector<1x8x1xf32> to vector<1x8x128xf32>
    %14 = arith.subf %10, %13 : vector<1x8x128xf32>
    %15 = math.exp %14 : vector<1x8x128xf32>
    %cst_11 = arith.constant dense<0.000000e+00> : vector<1x8xf32>
    %16 = vector.multi_reduction <add>, %15, %cst_11 [2] : vector<1x8x128xf32> to vector<1x8xf32>
    %17 = vector.shape_cast %16 : vector<1x8xf32> to vector<1x8x1xf32>
    %18 = tpu.reciprocal %17 {approx = true} : vector<1x8x1xf32> -> vector<1x8x1xf32>
    %19 = vector.broadcast %18 : vector<1x8x1xf32> to vector<1x8x128xf32>
    %20 = arith.mulf %15, %19 : vector<1x8x128xf32>
    %21 = arith.truncf %20 : vector<1x8x128xf32> to vector<1x8x128xbf16>
    "tpu.trace_start"() <{level = 10 : i32, message = "bqk,bkd->bqd"}> : () -> ()
    %cst_12 = arith.constant dense<0.000000e+00> : vector<1x8x128xf32>
    %22 = tpu.matmul %21, %2, %cst_12 {dimension_numbers = #tpu.dot_dimension_numbers<[2], [1], [1], [2], [0, 0, 0, 1, 1, 2], [0], [0]>} : vector<1x8x128xbf16>, vector<1x128x128xbf16>, vector<1x8x128xf32> -> vector<1x8x128xf32>
    "tpu.trace_stop"() : () -> ()
    %23 = arith.truncf %22 : vector<1x8x128xf32> to vector<1x8x128xbf16>
    %24 = vector.shape_cast %23 : vector<1x8x128xbf16> to vector<8x128xbf16>
    %c0_13 = arith.constant 0 : index
    %c0_14 = arith.constant 0 : index
    %25 = vector.load %arg4[%c0_13, %c0_14] : memref<128x128xbf16, #tpu.memory_space<vmem>>, vector<128x128xbf16>
    %cst_15 = arith.constant dense<0.000000e+00> : vector<8x128xf32>
    %26 = tpu.matmul %24, %25, %cst_15 {dimension_numbers = #tpu.dot_dimension_numbers<[1], [0], [0], [1], [0, 0, 1, 1], [], []>} : vector<8x128xbf16>, vector<128x128xbf16>, vector<8x128xf32> -> vector<8x128xf32>
    %c0_16 = arith.constant 0 : index
    %c0_17 = arith.constant 0 : index
    %27 = vector.load %arg5[%c0_16, %c0_17] : memref<1x128xf32, #tpu.memory_space<vmem>>, vector<1x128xf32>
    %28 = vector.broadcast %27 : vector<1x128xf32> to vector<8x128xf32>
    %29 = arith.addf %26, %28 : vector<8x128xf32>
    %30 = vector.shape_cast %29 : vector<8x128xf32> to vector<1x8x128xf32>
    %c0_18 = arith.constant 0 : index
    %c0_19 = arith.constant 0 : index
    %c0_20 = arith.constant 0 : index
    %31 = vector.load %arg6[%c0_18, %c0_19, %c0_20] : memref<1x8x128xf32, #tpu.memory_space<vmem>>, vector<1x8x128xf32>
    tpu.vector_store %arg6[%c0_18, %c0_19, %c0_20], %30 {strides = array<i32>} : memref<1x8x128xf32, #tpu.memory_space<vmem>>, vector<1x8x128xf32>,
    %c0_21 = arith.constant 0 : index
    %c0_22 = arith.constant 0 : index
    %c0_23 = arith.constant 0 : index
    %32 = vector.load %arg7[%c0_21, %c0_22, %c0_23] : memref<1x8x128xbf16, #tpu.memory_space<vmem>>, vector<1x8x128xbf16>
    tpu.vector_store %arg7[%c0_21, %c0_22, %c0_23], %21 {strides = array<i32>} : memref<1x8x128xbf16, #tpu.memory_space<vmem>>, vector<1x8x128xbf16>,
    return
  }
  func.func @transform_0(%arg0: i32) -> (i32, i32, i32) {
    %c0_i32 = arith.constant 0 : i32
    %c0_i32_0 = arith.constant 0 : i32
    %c0_i32_1 = arith.constant 0 : i32
    return %arg0, %c0_i32, %c0_i32_0 : i32, i32, i32
  }
  func.func @transform_1(%arg0: i32) -> (i32, i32, i32) {
    %c0_i32 = arith.constant 0 : i32
    %c0_i32_0 = arith.constant 0 : i32
    %c0_i32_1 = arith.constant 0 : i32
    return %arg0, %c0_i32, %c0_i32_0 : i32, i32, i32
  }
  func.func @transform_2(%arg0: i32) -> (i32, i32, i32) {
    %c0_i32 = arith.constant 0 : i32
    %c0_i32_0 = arith.constant 0 : i32
    %c0_i32_1 = arith.constant 0 : i32
    return %arg0, %c0_i32, %c0_i32_0 : i32, i32, i32
  }
  func.func @transform_3(%arg0: i32) -> (i32, i32) {
    %c0_i32 = arith.constant 0 : i32
    %c0_i32_0 = arith.constant 0 : i32
    %c0_i32_1 = arith.constant 0 : i32
    return %c0_i32, %c0_i32_0 : i32, i32
  }
  func.func @transform_4(%arg0: i32) -> (i32, i32) {
    %c0_i32 = arith.constant 0 : i32
    %c0_i32_0 = arith.constant 0 : i32
    %c0_i32_1 = arith.constant 0 : i32
    return %c0_i32, %c0_i32_0 : i32, i32
  }
  func.func @transform_5(%arg0: i32) -> (i32, i32, i32) {
    %c0_i32 = arith.constant 0 : i32
    %c0_i32_0 = arith.constant 0 : i32
    %c0_i32_1 = arith.constant 0 : i32
    return %arg0, %c0_i32, %c0_i32_0 : i32, i32, i32
  }
  func.func @transform_6(%arg0: i32) -> (i32, i32, i32) {
    %c0_i32 = arith.constant 0 : i32
    %c0_i32_0 = arith.constant 0 : i32
    %c0_i32_1 = arith.constant 0 : i32
    return %arg0, %c0_i32, %c0_i32_0 : i32, i32, i32
  }
}

</mosaic_0001>

<bundles_post_ra>
// kernel: tpu_custom_call.1
= control target key start
LH: loop header
LB: loop body
LE: loop exit
PB: predicated region body
PF: predicated region fallthrough
CT: control target
= control target key end

     0   :  { %s1558_s0 = inlined_call_operand.hbm [shape: bf16[2,8,128], index: 0, kind: input, shape index: {}]   ;;  %s1559_s1 = inlined_call_operand.hbm [shape: bf16[2,128,128], index: 1, kind: input, shape index: {}]   ;;  %s1560_s2 = inlined_call_operand.hbm [shape: bf16[2,128,128], index: 2, kind: input, shape index: {}]   ;;  %s1561_s3 = inlined_call_operand.hbm [shape: bf16[128,128], index: 3, kind: input, shape index: {}]   ;;  %s1562_s4 = inlined_call_operand.vmem [shape: f32[1,128], index: 4, kind: input, shape index: {}]   ;;  %s1563_s5 = inlined_call_operand.hbm [shape: f32[2,8,128], index: 5, kind: output, shape index: {0}]   ;;  %s1564_s6 = inlined_call_operand.hbm [shape: bf16[2,8,128], index: 6, kind: output, shape index: {1}]  }
   0x1   :  { %1575 = sst [smem:[#allocation23_spill]] %s1559_s1 }
   0x2   :  { %1576 = sst [smem:[#allocation24_spill]] %s1561_s3 }
   0x3   :  { %12 = vsyncpa [#allocation3], 0 }
   0x4   :  { %14 = vsyncpa [#allocation3 + $0x1], 0 }
   0x5   :  { %15 = vsyncpa [#allocation6], 0 }
   0x6   :  { %17 = vsyncpa [#allocation6 + $0x1], 0 }
   0x7   :  { %18 = vsyncpa [#allocation9], 0 }
   0x8   :  { %19 = vsyncpa [#allocation4], 0 }
   0x9   :  { %21 = vsyncpa [#allocation4 + $0x1], 0 }
   0xa   :  { %22 = vsyncpa [#allocation12], 0 }
   0xb   :  { %24 = vsyncpa [#allocation12 + $0x1], 0  ;;  %s1315_s21 = smov 0   ;;  %s1317_s22 = smov 0  }
   0xc   :  { %s1319_s23 = smov 0   ;;  %s1321_s24 = smov 0  }
   0xd LB: > { %1577 = sst [smem:[#allocation18_spill]] %s1263_s21  ;;  %s1336_s25 = sadd.s32 1, %s1275_s24   ;;  %s1275_s24 = sphi %s1321_s24, %s1596_s24   ;;  %s1271_s23 = sphi %s1319_s23, %s1598_s23   ;;  %s1267_s22 = sphi %s1317_s22, %s1600_s22   ;;  %s1263_s21 = sphi %s1315_s21, %s1599_s21  }
   0xe   : > { %1578 = sst [smem:[#allocation19_spill]] %s1271_s23  ;;  %s37_s26 = sadd.s32 1, %s1271_s23 }
   0xf   : > { %1579 = sst [smem:[#allocation20_spill]] %s1336_s25  ;;  %s34_s27 = ssub.s32 %s1275_s24, %s1336_s25 }
  0x10   : > { %p44_p0 = scmp.ne.s32.totalorder %s1271_s23, %s1267_s22  ;;  %p35_p1 = scmp.eq.s32.totalorder %s34_s27, 0 }
  0x11   : > { %p45_p2 = scmp.eq.s32.totalorder %s1275_s24, 0  ;;  %p1006_p5 = scmp.lt.s32.totalorder %s1275_s24, 2 }
  0x12   : > { %s1345_s28 = scalar_select %p35_p1, %s1271_s23, %s37_s26  }
  0x13   : > { %p46_p3 = por %p45_p2, %p44_p0  ;;  %s1353_s29 = sand.u32 1, %s1271_s23  }
  0x14   : > { %1580 = sst [smem:[#allocation21_spill]] %s1345_s28  ;;  %s256_s30 = sand.u32 1, %s1275_s24  }
  0x15   : > { %s829_s7 = sshll.u32 %s1353_s29, 6  ;;  %p1357_p6 = pnand %p1006_p5, %p46_p3 }
  0x16   : > { %s944_s9 = sshll.u32 %s1275_s24, 6  ;;  %s1582_s1 = sld [smem:[#allocation23_spill]] }
  0x17   : > { %s260_s14 = scalar_lea.vmem [#allocation5], %s829_s7  ;;  %s1367_s16 = scalar_lea.sflag [#allocation6], %s256_s30 }
  0x18   : > { %s268_s15 = sshll.u32 %s260_s14, 4  ;;  %p1053_p8 = pneg %p1357_p6  ;;  %s269_s15 = int_to_ptr.vmem [resolvable:$true] %s268_s15 }
  0x1c   : > { %s265_s12 = scalar_lea.hbm %s1582_s1, %s944_s9  ;;  %s1056_s26 = scalar_lea.hbm %s1582_s1, 128 }
  0x1d   : > { %s266_s13 = sshll.u32 %s265_s12, 4  ;;  %s267_s13 = int_to_ptr.hbm [resolvable:$true] %s266_s13 }
  0x1e   : > { %s1049_s17 = sshra.s32 %s267_s13, 4  ;;  %s1050_s17 = int_to_ptr.hbm [resolvable:$true] %s1049_s17 }
  0x1f   : > { %s1051_s18 = scalar_lea.hbm %s1050_s17, 64  ;;  %p1057_p11 = scmp.lt.s32.totalorder %s1050_s17, %s1582_s1 }
  0x20   : > { %p1052_p7 = scmp.ne.s32.totalorder %s1050_s17, %s1051_s18  ;;  %p1058_p12 = scmp.lt.s32.totalorder %s1056_s26, %s1051_s18 }
  0x22   : > { %p1054_p9 = pnand %p1053_p8, %p1052_p7  ;;  %p1059_p13 = por %p1058_p12, %p1057_p11 }
  0x24   : > { %p1055_p10 = pneg %p1054_p9 }
  0x26   : > { %p1060_p1 = pnand %p1059_p13, %p1055_p10 }
  0x28   : > { %1063 = shalt.err (!%p1060_p1)
}
  0x29   : > { %s1565_s30 = smov 64   ;;  %s1567_s11 = smov 4  }
  0x2a   : > { %994 = dma.hbm_to_vmem [thread:$0]  (!%p1357_p6), %s267_s13, 1024, %s269_s15, %s1367_s16, %s1565_s30, %s1565_s30, %s1567_s11  }
  0x2b   : > { %s287_s17 = scalar_lea.hbm %s1560_s2, %s944_s9  ;;  %s282_s19 = scalar_lea.vmem [#allocation7], %s829_s7 }
  0x2c   : > { %s288_s18 = sshll.u32 %s287_s17, 4  ;;  %s290_s20 = sshll.u32 %s282_s19, 4  ;;  %s1391_s18 = int_to_ptr.hbm [resolvable:$true] %s288_s18  ;;  %s1393_s20 = int_to_ptr.vmem [resolvable:$true] %s290_s20 }
  0x2d   : > { %s1396_s26 = sadd.s32 4294967295, %s1275_s24   ;;  %s823_s27 = sadd.s32 4294967294, %s1275_s24  }
  0x2e   : > { %p50_p2 = scmp.ne.s32.totalorder %s1267_s22, %s1263_s21  ;;  %p1574_p3 = scmp.eq.s32.totalorder %s1396_s26, 0 }
  0x2f   : > { %p168_p5 = scmp.eq.s32.totalorder %s1396_s26, 1  ;;  %p174_p7 = scmp.eq.s32.totalorder %s823_s27, 1 }
  0x30   : > { %p1405_p9 = por %p1574_p3, %p50_p2  ;;  %p824_p10 = scmp.ge.s32.totalorder %s1275_s24, 1 }
  0x31   : > { %p1413_p11 = por %p168_p5, %p44_p0  ;;  %p1417_p12 = por %p174_p7, %p50_p2 }
  0x32   : > { %p207_p13 = scmp.lt.s32.totalorder %s1275_s24, 3  ;;  %s1587_s3 = sld [smem:[#allocation24_spill]] }
  0x33   : > { %s1585_s13 = scalar_select %p1417_p12, 1, 0 }
  0x34   : > { %p1425_p1 = pnand %p824_p10, %p207_p13  ;;  %s1279_s17 = smov [#allocation8]  }
  0x35   : > { %1586 = sst [smem:[#allocation22_spill]] %s1585_s13  ;;  %s220_s19 = sshll.u32 %s1279_s17, 4  ;;  %s221_s19 = int_to_ptr.vmem [resolvable:$true] %s220_s19 }
  0x36   : > { %p984_p0 = pneg %p1425_p1  ;;  %s827_s27 = sshll.u32 %s1353_s29, 2 }
  0x37   : > { %s828_s30 = sshll.u32 %s1275_s24, 2  ;;  %s241_s1 = scalar_lea.vmem [#allocation2], %s827_s27 }
  0x38   : > { %s218_s12 = sshll.u32 %s1587_s3, 4  ;;  %p985_p2 = pnand %p984_p0, %p1574_p3  ;;  %s219_s12 = int_to_ptr.hbm [resolvable:$true] %s218_s12 }
  0x39   : > { %s245_s10 = scalar_lea.hbm %s1558_s0, %s828_s30  ;;  %s249_s3 = sshll.u32 %s241_s1, 4  ;;  %s250_s3 = int_to_ptr.vmem [resolvable:$true] %s249_s3 }
  0x3a   : > { %s247_s28 = sshll.u32 %s245_s10, 4  ;;  %s1589_s23 = smov 4   ;;  %s248_s28 = int_to_ptr.hbm [resolvable:$true] %s247_s28 }
  0x3b   : > { %s1590_s25 = smov 64   ;;  %s238_s17 = scalar_lea.sflag [#allocation3], %s1353_s29 }
  0x3c   : > { %987 = dma.hbm_to_vmem [thread:$0]  (!%p985_p2), %s219_s12, 1024, %s221_s19, [#allocation9], %s1590_s25, %s1590_s25, %s1589_s23  }
  0x3d   : > { %s1109_s13 = sshra.s32 %s248_s28, 4  ;;  %s1116_s1 = scalar_lea.hbm %s1558_s0, 8  ;;  %s1110_s13 = int_to_ptr.hbm [resolvable:$true] %s1109_s13 }
  0x3e   : > { %s1111_s21 = scalar_lea.hbm %s1110_s13, 4  ;;  %p1117_p13 = scmp.lt.s32.totalorder %s1110_s13, %s1558_s0 }
  0x3f   : > { %p1112_p5 = scmp.ne.s32.totalorder %s1110_s13, %s1111_s21  ;;  %p1118_p0 = scmp.lt.s32.totalorder %s1116_s1, %s1111_s21 }
  0x41   : > { %p1114_p7 = pnand %p1112_p5, %p1053_p8  ;;  %p1119_p2 = por %p1118_p0, %p1117_p13 }
  0x43   : > { %p1115_p10 = pneg %p1114_p7 }
  0x45   : > { %p1120_p4 = pnand %p1119_p2, %p1115_p10 }
  0x47   : > { %1123 = shalt.err (!%p1120_p4)
}
  0x48   : > { %991 = dma.hbm_to_vmem [thread:$0]  (!%p1357_p6), %s248_s28, 64, %s250_s3, %s238_s17  }
  0x49   : > { %s1139_s29 = sshra.s32 %s1391_s18, 4  ;;  %s1146_s21 = scalar_lea.hbm %s1560_s2, 128  ;;  %s1140_s29 = int_to_ptr.hbm [resolvable:$true] %s1139_s29 }
  0x4a   : > { %s1141_s12 = scalar_lea.hbm %s1140_s29, 64  ;;  %p1147_p4 = scmp.lt.s32.totalorder %s1140_s29, %s1560_s2 }
  0x4b   : > { %p1142_p5 = scmp.ne.s32.totalorder %s1140_s29, %s1141_s12  ;;  %p1148_p10 = scmp.lt.s32.totalorder %s1146_s21, %s1141_s12 }
  0x4d   : > { %p1144_p7 = pnand %p1142_p5, %p1053_p8  ;;  %p1149_p13 = por %p1148_p10, %p1147_p4 }
  0x4f   : > { %p1145_p3 = pneg %p1144_p7 }
  0x51   : > { %p1150_p0 = pnand %p1149_p13, %p1145_p3 }
  0x53   : > { %1153 = shalt.err (!%p1150_p0)
}
  0x54   : > { %997 = dma.hbm_to_vmem [thread:$0]  (!%p1357_p6), %s1391_s18, 1024, %s1393_s20, %s1367_s16, %s1590_s25, %s1590_s25, %s1589_s23  }
  0x55   : > { %302 = sbr.rel (%p1425_p1) target bundleno = 812 (0x32c), region = 40  ;;  %s1474_s3 = sand.u32 (!%p1425_p1), 1, %s1267_s22  }
  0x56   : > { %s836_s28 = sshll.u32 (!%p1425_p1), %s1474_s3, 2  ;;  %s305_s17 = scalar_lea.sflag (!%p1425_p1), [#allocation3], %s1474_s3 }
  0x57   : > { %s308_s8 = scalar_lea.vmem (!%p1425_p1), [#allocation2], %s836_s28 }
  0x5a   : > { %1242 = dma.done.wait (%p1405_p9), %s305_s17, 64  }
  0x5b   : > { %1244 = vsyncadd (%p1405_p9), %s305_s17, 4294967232  ;;  %s314_s23 = sand.u32 1, %s1396_s26   ;;  %s837_s25 = sshll.u32 %s1474_s3, 6 }
  0x5c   : > { %s315_s16 = scalar_lea.sflag [#allocation6], %s314_s23  ;;  %s318_s18 = scalar_lea.vmem [#allocation5], %s837_s25 }
  0x5d   : > { %1246 = dma.done.wait (%p1405_p9), %s315_s16, 2048  }
  0x5e   : > { %1248 = vsyncadd (%p1405_p9), %s315_s16, 4294965248  ;;  %s1490_s20 = scalar_lea.vmem [#allocation7], %s837_s25  ;;  %p1591_p6 = scmp.eq.s32.totalorder %s1396_s26, 0 }
  0x60   : > { %1250 = dma.done.wait (%p1591_p6), [#allocation9], 1024   ;;  %p1592_p8 = pmov %p1591_p6 }
  0x61   : > { %v953_v0 = vld [vmem:[%s318_s18 + $0x38] sm:$0xff]  ;;  %v952_v1 = vld [vmem:[%s318_s18 + $0x30] sm:$0xff]  ;;  %v951_v2 = vld [vmem:[%s318_s18 + $0x28] sm:$0xff]  ;;  %v473_v9 = vlaneseq  ;;  %s377_s7 = scalar_lea.vmem [#allocation11], %s836_s28  ;;  %s941_s14 = sshll.u32 %s1396_s26, 2 }
  0x62   : > { %1252 = vsyncadd (%p1592_p8), [#allocation9], 4294966272  ;;  %459 = vmatpush.bf16.xpose.msra.mxu0 %v953_v0  ;;  %v950_v3 = vld [vmem:[%s318_s18 + $0x20] sm:$0xff]  ;;  %v949_v4 = vld [vmem:[%s318_s18 + $0x18] sm:$0xff]  ;;  %s662_s27 = scalar_lea.hbm %s1564_s6, %s941_s14  ;;  %s664_s15 = sshll.u32 %s377_s7, 4  ;;  %s665_s15 = int_to_ptr.vmem [resolvable:$true] %s664_s15 }
  0x63   : > { %v948_v5 = vld [vmem:[%s318_s18 + $0x10] sm:$0xff]  ;;  %v947_v6 = vld [vmem:[%s318_s18 + $0x8] sm:$0xff]  ;;  %v946_v7 = vld [vmem:[%s318_s18] sm:$0xff]  ;;  %v474_v10 = vand.u32 127, %v473_v9  ;;  %s666_s29 = sshll.u32 %s662_s27, 4  ;;  %s638_s12 = scalar_lea.sflag [#allocation12], %s1474_s3  ;;  %s667_s29 = int_to_ptr.hbm [resolvable:$true] %s666_s29 }
  0x64   : > { %v378_v8 = vld [vmem:[%s308_s8] sm:$0xf]  ;;  %v960_v16 = vld [vmem:[%s1490_s20 + $0x30] sm:$0xff]  ;;  %v959_v17 = vld [vmem:[%s1490_s20 + $0x28] sm:$0xff]  ;;  %s1183_s19 = sshra.s32 %s667_s29, 4  ;;  %s1189_s11 = scalar_lea.hbm %s1564_s6, 8  ;;  %s1184_s19 = int_to_ptr.hbm [resolvable:$true] %s1183_s19 }
  0x65   : > { %vm475_vm0 = vcmp.lt.s32.totalorder %v474_v10, 8  ;;  %v961_v15 = vld [vmem:[%s1490_s20 + $0x38] sm:$0xff]  ;;  %v958_v18 = vld [vmem:[%s1490_s20 + $0x20] sm:$0xff]  ;;  %v956_v24 = vld [vmem:[%s1490_s20 + $0x10] sm:$0xff]  ;;  %s1185_s10 = scalar_lea.hbm %s1184_s19, 4  ;;  %p1190_p2 = scmp.lt.s32.totalorder %s1184_s19, %s1564_s6 }
  0x66   : > { %535 = vmatpush.bf16.msra.mxu1 %v961_v15  ;;  %v957_v19 = vld [vmem:[%s1490_s20 + $0x18] sm:$0xff]  ;;  %v955_v25 = vld [vmem:[%s1490_s20 + $0x8] sm:$0xff]  ;;  %v954_v26 = vld [vmem:[%s1490_s20] sm:$0xff]  ;;  %p1186_p3 = scmp.ne.s32.totalorder %s1184_s19, %s1185_s10  ;;  %p1191_p5 = scmp.lt.s32.totalorder %s1189_s11, %s1185_s10 }
  0x67   : > { %v969_v27 = vld [vmem:[#allocation8 + $0x38] sm:$0xff]  ;;  %v968_v28 = vld [vmem:[#allocation8 + $0x30] sm:$0xff]  ;;  %v967_v29 = vld [vmem:[#allocation8 + $0x28] sm:$0xff] }
  0x68   : > { %617 = vmatpush.bf16.msra.mxu2 %v969_v27  ;;  %v966_v30 = vld [vmem:[#allocation8 + $0x20] sm:$0xff]  ;;  %v965_v31 = vld [vmem:[#allocation8 + $0x18] sm:$0xff]  ;;  %v964_v32 = vld [vmem:[#allocation8 + $0x10] sm:$0xff]  ;;  %p1187_p9 = pnand %p1186_p3, %p1413_p11  ;;  %p1192_p7 = por %p1191_p5, %p1190_p2 }
  0x69   : > { %v963_v34 = vld [vmem:[#allocation8 + $0x8] sm:$0xff]  ;;  %v962_v38 = vld [vmem:[#allocation8] sm:$0xff] }
  0x6a   : > { %460 = vmatpush.bf16.xpose.msra.mxu0 %v952_v1  ;;  %536 = vmatpush.bf16.msra.mxu1 %v960_v16  ;;  %p1188_p1 = pneg %p1187_p9 }
  0x6c   : > { %618 = vmatpush.bf16.msra.mxu2 %v968_v28  ;;  %p1193_p4 = pnand %p1192_p7, %p1188_p1 }
  0x6e   : > { %537 = vmatpush.bf16.msra.mxu1 %v959_v17 }
  0x70   : > { %619 = vmatpush.bf16.msra.mxu2 %v967_v29 }
  0x72   : > { %461 = vmatpush.bf16.xpose.msra.mxu0 %v951_v2  ;;  %538 = vmatpush.bf16.msra.mxu1 %v958_v18 }
  0x74   : > { %620 = vmatpush.bf16.msra.mxu2 %v966_v30 }
  0x76   : > { %539 = vmatpush.bf16.msra.mxu1 %v957_v19 }
  0x78   : > { %621 = vmatpush.bf16.msra.mxu2 %v965_v31 }
  0x7a   : > { %462 = vmatpush.bf16.xpose.msra.mxu0 %v950_v3  ;;  %540 = vmatpush.bf16.msra.mxu1 %v956_v24 }
  0x7c   : > { %622 = vmatpush.bf16.msra.mxu2 %v964_v32 }
  0x7e   : > { %541 = vmatpush.bf16.msra.mxu1 %v955_v25 }
  0x80   : > { %623 = vmatpush.bf16.msra.mxu2 %v963_v34 }
  0x82   : > { %463 = vmatpush.bf16.xpose.msra.mxu0 %v949_v4  ;;  %542 = vmatpush.bf16.msra.mxu1 %v954_v26 }
  0x84   : > { %624 = vmatpush.bf16.msra.mxu2 %v962_v38 }
  0x8a   : > { %464 = vmatpush.bf16.xpose.msra.mxu0 %v948_v5 }
  0x92   : > { %465 = vmatpush.bf16.xpose.msra.mxu0 %v947_v6 }
  0x9a   : > { %466 = vmatpush.bf16.xpose.msra.mxu0 %v946_v7 }
  0xa1   : > { %467 = vmatmul.bf16.vlgmr.msra.gmra.mxu0 %v378_v8 }
 0x11e   : > { %v468_v11 = vpop.f32.mrf.mxu0 }
 0x11f   : > { %v472_v12 = vmul.f32 0.17677669, %v468_v11 }
 0x121   : > { %v476_v13 = vsel %vm475_vm0, %v472_v12, -1e+30 }
 0x122   : > { %477 = vmax.xlane.f32.xlu0 %v476_v13 }
 0x126   : > { %v470_v14 = vpop.f32.mrf.mxu0 }
 0x195   : > { %v478_v20 = vpop.xlane.xlu0 %477 }
 0x196   : > { %v479_v21 = vsub.f32 %v476_v13, %v478_v20 }
 0x198   : > { %v480_v22 = vmul.f32 1.442695, %v479_v21 }
 0x19a   : > { %1045 = vpow2.f32 %v480_v22 }
 0x1a0   : > { %v1046_v23 = vpop.eup %1045 }
 0x1a1   : > { %482 = vadd.xlane.f32.xlu0 %v1046_v23 }
 0x214   : > { %v483_v33 = vpop.xlane.xlu0 %482 }
 0x215   : > { %1047 = vrcp.f32 %v483_v33 }
 0x21b   : > { %v1048_v35 = vpop.eup %1047 }
 0x21c   : > { %v485_v36 = vmul.f32 %v1048_v35, %v1046_v23 }
 0x21e   : > { %v486_v37 = vpack.c.bf16 %v485_v36, %v485_v36 }
 0x220   : > { %543 = vmatmul.bf16.vlgmr.msra.gmra.mxu1 %v486_v37  ;;  %631 = vst [vmem:[%s377_s7] sm:$0xf] %v486_v37 }
 0x29d   : > { %v544_v39 = vpop.f32.mrf.mxu1 }
 0x29e   : > { %v548_v40 = vpack.c.bf16 %v544_v39, %v544_v39 }
 0x2a0   : > { %625 = vmatmul.bf16.vlgmr.msra.gmra.mxu2 %v548_v40 }
 0x2a5   : > { %v546_v41 = vpop.f32.mrf.mxu1 }
 0x2a6   : > { %1196 = shalt.err (!%p1193_p4)
}
 0x2a7   : > { %981 = dma.vmem_to_hbm [thread:$0]  (%p1413_p11), %s665_s15, 64, %s667_s29, %s638_s12   ;;  %v1044_v42 = vld [vmem:[%s1562_s4] ss:$0 sm:$0xff] }
 0x2a8   : > { %s940_s8 = sshll.u32 %s1396_s26, 3  ;;  %s840_s23 = sshll.u32 %s1474_s3, 3 }
 0x2a9   : > { %s648_s18 = scalar_lea.hbm %s1563_s5, %s940_s8  ;;  %s370_s14 = scalar_lea.vmem [#allocation10], %s840_s23 }
 0x2aa   : > { %s650_s30 = sshll.u32 %s370_s14, 4  ;;  %s652_s1 = sshll.u32 %s648_s18, 4  ;;  %s651_s30 = int_to_ptr.vmem [resolvable:$true] %s650_s30  ;;  %s653_s1 = int_to_ptr.hbm [resolvable:$true] %s652_s1 }
 0x2ab   : > { %s633_s27 = scalar_lea.sflag [#allocation4], %s1474_s3  ;;  %s1211_s26 = sshra.s32 %s653_s1, 4  ;;  %s1212_s26 = int_to_ptr.hbm [resolvable:$true] %s1211_s26 }
 0x2ac   : > { %s1213_s15 = scalar_lea.hbm %s1212_s26, 8  ;;  %s1217_s19 = scalar_lea.hbm %s1563_s5, 16 }
 0x2ad   : > { %p1214_p10 = scmp.ne.s32.totalorder %s1212_s26, %s1213_s15  ;;  %p1218_p6 = scmp.lt.s32.totalorder %s1212_s26, %s1563_s5 }
 0x2ae   : > { %p1219_p8 = scmp.lt.s32.totalorder %s1217_s19, %s1213_s15 }
 0x2af   : > { %p1215_p13 = pnand %p1214_p10, %p1413_p11 }
 0x2b0   : > { %p1220_p3 = por %p1219_p8, %p1218_p6 }
 0x2b1   : > { %p1216_p0 = pneg %p1215_p13 }
 0x2b3   : > { %p1221_p9 = pnand %p1220_p3, %p1216_p0 }
 0x323   : > { %v626_v43 = vpop.f32.mrf.mxu2 }
 0x324   : > { %v627_v44 = vadd.f32 %v1044_v42, %v626_v43 }
 0x326   : > { %630 = vst [vmem:[%s370_s14] sm:$0xff] %v627_v44 }
 0x327   : > { %1224 = shalt.err (!%p1221_p9)
}
 0x328   : > { %980 = dma.vmem_to_hbm [thread:$0]  (%p1413_p11), %s651_s30, 128, %s653_s1, %s633_s27  }
 0x32b   : > { %v628_v45 = vpop.f32.mrf.mxu2 }
 0x32c PF: > { %s1593_s3 = sld [smem:[#allocation18_spill]]  ;;  %p1595_p1 = scmp.ge.s32.totalorder %s1275_s24, 2 }
 0x32e   : > { %p999_p2 = pnand %p1595_p1, %p1417_p12 }
 0x330   : > { %p1000_p5 = pneg %p999_p2 }
 0x332   : > { %s678_s11 = sand.u32 1, %s1593_s3  }
 0x333   : > { %s679_s28 = scalar_lea.sflag [#allocation4], %s678_s11 }
 0x334   : > { %1254 = dma.done.wait (%p1000_p5), %s679_s28, 128  }
 0x335   : > { %1256 = vsyncadd (%p1000_p5), %s679_s28, 4294967168  ;;  %s689_s17 = scalar_lea.sflag [#allocation12], %s678_s11 }
 0x336   : > { %1258 = dma.done.wait (%p1000_p5), %s689_s17, 64  }
 0x337   : > { %1260 = vsyncadd (%p1000_p5), %s689_s17, 4294967232  ;;  %s1596_s24 = sld [smem:[#allocation20_spill]]  ;;  %s1599_s21 = smov %s1267_s22 }
 0x338   : > { %s1597_s9 = sld [smem:[#allocation19_spill]] }
 0x339   : > { %s1598_s23 = sld [smem:[#allocation21_spill]] }
 0x33d   : > { %p27_p11 = scmp.ge.s32.totalorder %s1596_s24, 4  }
 0x33e   : > { %s1600_s22 = smov %s1597_s9 }
 0x33f   :  { %29 = sbr.rel (!%p27_p11) target bundleno = 13 (0xd), region = 130 }
 0x344   :  { %695 = vsyncpa [#allocation3], 1 }
 0x345   :  { %697 = vsyncpa [#allocation3 + $0x1], 1 }
 0x346   :  { %698 = vsyncpa [#allocation6], 1 }
 0x347   :  { %700 = vsyncpa [#allocation6 + $0x1], 1 }
 0x348   :  { %701 = vsyncpa [#allocation9], 1 }
 0x349   :  { %702 = vsyncpa [#allocation4], 1 }
 0x34a   :  { %704 = vsyncpa [#allocation4 + $0x1], 1 }
 0x34b   :  { %705 = vsyncpa [#allocation12], 1 }
 0x34c   :  { %707 = vsyncpa [#allocation12 + $0x1], 1 }

// kernel: tpu_custom_call.1
= control target key start
LH: loop header
LB: loop body
LE: loop exit
PB: predicated region body
PF: predicated region fallthrough
CT: control target
= control target key end

     0   :  { %s1558_s0 = inlined_call_operand.hbm [shape: bf16[2,8,128], index: 0, kind: input, shape index: {}]   ;;  %s1559_s1 = inlined_call_operand.hbm [shape: bf16[2,128,128], index: 1, kind: input, shape index: {}]   ;;  %s1560_s2 = inlined_call_operand.hbm [shape: bf16[2,128,128], index: 2, kind: input, shape index: {}]   ;;  %s1561_s3 = inlined_call_operand.hbm [shape: bf16[128,128], index: 3, kind: input, shape index: {}]   ;;  %s1562_s4 = inlined_call_operand.vmem [shape: f32[1,128], index: 4, kind: input, shape index: {}]   ;;  %s1563_s5 = inlined_call_operand.hbm [shape: f32[2,8,128], index: 5, kind: output, shape index: {0}]   ;;  %s1564_s6 = inlined_call_operand.hbm [shape: bf16[2,8,128], index: 6, kind: output, shape index: {1}]  }
   0x1   :  { %1575 = sst [smem:[#allocation23_spill]] %s1559_s1 }
   0x2   :  { %1576 = sst [smem:[#allocation24_spill]] %s1561_s3 }
   0x3   :  { %12 = vsyncpa [#allocation3], 0 }
   0x4   :  { %14 = vsyncpa [#allocation3 + $0x1], 0 }
   0x5   :  { %15 = vsyncpa [#allocation6], 0 }
   0x6   :  { %17 = vsyncpa [#allocation6 + $0x1], 0 }
   0x7   :  { %18 = vsyncpa [#allocation9], 0 }
   0x8   :  { %19 = vsyncpa [#allocation4], 0 }
   0x9   :  { %21 = vsyncpa [#allocation4 + $0x1], 0 }
   0xa   :  { %22 = vsyncpa [#allocation12], 0 }
   0xb   :  { %24 = vsyncpa [#allocation12 + $0x1], 0  ;;  %s1315_s21 = smov 0   ;;  %s1317_s22 = smov 0  }
   0xc   :  { %s1319_s23 = smov 0   ;;  %s1321_s24 = smov 0  }
   0xd LB: > { %1577 = sst [smem:[#allocation18_spill]] %s1263_s21  ;;  %s1336_s25 = sadd.s32 1, %s1275_s24   ;;  %s1275_s24 = sphi %s1321_s24, %s1596_s24   ;;  %s1271_s23 = sphi %s1319_s23, %s1598_s23   ;;  %s1267_s22 = sphi %s1317_s22, %s1600_s22   ;;  %s1263_s21 = sphi %s1315_s21, %s1599_s21  }
   0xe   : > { %1578 = sst [smem:[#allocation19_spill]] %s1271_s23  ;;  %s37_s26 = sadd.s32 1, %s1271_s23 }
   0xf   : > { %1579 = sst [smem:[#allocation20_spill]] %s1336_s25  ;;  %s34_s27 = ssub.s32 %s1275_s24, %s1336_s25 }
  0x10   : > { %p44_p0 = scmp.ne.s32.totalorder %s1271_s23, %s1267_s22  ;;  %p35_p1 = scmp.eq.s32.totalorder %s34_s27, 0 }
  0x11   : > { %p45_p2 = scmp.eq.s32.totalorder %s1275_s24, 0  ;;  %p1006_p5 = scmp.lt.s32.totalorder %s1275_s24, 2 }
  0x12   : > { %s1345_s28 = scalar_select %p35_p1, %s1271_s23, %s37_s26  }
  0x13   : > { %p46_p3 = por %p45_p2, %p44_p0  ;;  %s1353_s29 = sand.u32 1, %s1271_s23  }
  0x14   : > { %1580 = sst [smem:[#allocation21_spill]] %s1345_s28  ;;  %s256_s30 = sand.u32 1, %s1275_s24  }
  0x15   : > { %s829_s7 = sshll.u32 %s1353_s29, 6  ;;  %p1357_p6 = pnand %p1006_p5, %p46_p3 }
  0x16   : > { %s944_s9 = sshll.u32 %s1275_s24, 6  ;;  %s1582_s1 = sld [smem:[#allocation23_spill]] }
  0x17   : > { %s260_s14 = scalar_lea.vmem [#allocation5], %s829_s7  ;;  %s1367_s16 = scalar_lea.sflag [#allocation6], %s256_s30 }
  0x18   : > { %s268_s15 = sshll.u32 %s260_s14, 4  ;;  %p1053_p8 = pneg %p1357_p6  ;;  %s269_s15 = int_to_ptr.vmem [resolvable:$true] %s268_s15 }
  0x1c   : > { %s265_s12 = scalar_lea.hbm %s1582_s1, %s944_s9  ;;  %s1056_s26 = scalar_lea.hbm %s1582_s1, 128 }
  0x1d   : > { %s266_s13 = sshll.u32 %s265_s12, 4  ;;  %s267_s13 = int_to_ptr.hbm [resolvable:$true] %s266_s13 }
  0x1e   : > { %s1049_s17 = sshra.s32 %s267_s13, 4  ;;  %s1050_s17 = int_to_ptr.hbm [resolvable:$true] %s1049_s17 }
  0x1f   : > { %s1051_s18 = scalar_lea.hbm %s1050_s17, 64  ;;  %p1057_p11 = scmp.lt.s32.totalorder %s1050_s17, %s1582_s1 }
  0x20   : > { %p1052_p7 = scmp.ne.s32.totalorder %s1050_s17, %s1051_s18  ;;  %p1058_p12 = scmp.lt.s32.totalorder %s1056_s26, %s1051_s18 }
  0x22   : > { %p1054_p9 = pnand %p1053_p8, %p1052_p7  ;;  %p1059_p13 = por %p1058_p12, %p1057_p11 }
  0x24   : > { %p1055_p10 = pneg %p1054_p9 }
  0x26   : > { %p1060_p1 = pnand %p1059_p13, %p1055_p10 }
  0x28   : > { %1063 = shalt.err (!%p1060_p1)
}
  0x29   : > { %s1565_s30 = smov 64   ;;  %s1567_s11 = smov 4  }
  0x2a   : > { %994 = dma.hbm_to_vmem [thread:$0]  (!%p1357_p6), %s267_s13, 1024, %s269_s15, %s1367_s16, %s1565_s30, %s1565_s30, %s1567_s11  }
  0x2b   : > { %s287_s17 = scalar_lea.hbm %s1560_s2, %s944_s9  ;;  %s282_s19 = scalar_lea.vmem [#allocation7], %s829_s7 }
  0x2c   : > { %s288_s18 = sshll.u32 %s287_s17, 4  ;;  %s290_s20 = sshll.u32 %s282_s19, 4  ;;  %s1391_s18 = int_to_ptr.hbm [resolvable:$true] %s288_s18  ;;  %s1393_s20 = int_to_ptr.vmem [resolvable:$true] %s290_s20 }
  0x2d   : > { %s1396_s26 = sadd.s32 4294967295, %s1275_s24   ;;  %s823_s27 = sadd.s32 4294967294, %s1275_s24  }
  0x2e   : > { %p50_p2 = scmp.ne.s32.totalorder %s1267_s22, %s1263_s21  ;;  %p1574_p3 = scmp.eq.s32.totalorder %s1396_s26, 0 }
  0x2f   : > { %p168_p5 = scmp.eq.s32.totalorder %s1396_s26, 1  ;;  %p174_p7 = scmp.eq.s32.totalorder %s823_s27, 1 }
  0x30   : > { %p1405_p9 = por %p1574_p3, %p50_p2  ;;  %p824_p10 = scmp.ge.s32.totalorder %s1275_s24, 1 }
  0x31   : > { %p1413_p11 = por %p168_p5, %p44_p0  ;;  %p1417_p12 = por %p174_p7, %p50_p2 }
  0x32   : > { %p207_p13 = scmp.lt.s32.totalorder %s1275_s24, 3  ;;  %s1587_s3 = sld [smem:[#allocation24_spill]] }
  0x33   : > { %s1585_s13 = scalar_select %p1417_p12, 1, 0 }
  0x34   : > { %p1425_p1 = pnand %p824_p10, %p207_p13  ;;  %s1279_s17 = smov [#allocation8]  }
  0x35   : > { %1586 = sst [smem:[#allocation22_spill]] %s1585_s13  ;;  %s220_s19 = sshll.u32 %s1279_s17, 4  ;;  %s221_s19 = int_to_ptr.vmem [resolvable:$true] %s220_s19 }
  0x36   : > { %p984_p0 = pneg %p1425_p1  ;;  %s827_s27 = sshll.u32 %s1353_s29, 2 }
  0x37   : > { %s828_s30 = sshll.u32 %s1275_s24, 2  ;;  %s241_s1 = scalar_lea.vmem [#allocation2], %s827_s27 }
  0x38   : > { %s218_s12 = sshll.u32 %s1587_s3, 4  ;;  %p985_p2 = pnand %p984_p0, %p1574_p3  ;;  %s219_s12 = int_to_ptr.hbm [resolvable:$true] %s218_s12 }
  0x39   : > { %s245_s10 = scalar_lea.hbm %s1558_s0, %s828_s30  ;;  %s249_s3 = sshll.u32 %s241_s1, 4  ;;  %s250_s3 = int_to_ptr.vmem [resolvable:$true] %s249_s3 }
  0x3a   : > { %s247_s28 = sshll.u32 %s245_s10, 4  ;;  %s1589_s23 = smov 4   ;;  %s248_s28 = int_to_ptr.hbm [resolvable:$true] %s247_s28 }
  0x3b   : > { %s1590_s25 = smov 64   ;;  %s238_s17 = scalar_lea.sflag [#allocation3], %s1353_s29 }
  0x3c   : > { %987 = dma.hbm_to_vmem [thread:$0]  (!%p985_p2), %s219_s12, 1024, %s221_s19, [#allocation9], %s1590_s25, %s1590_s25, %s1589_s23  }
  0x3d   : > { %s1109_s13 = sshra.s32 %s248_s28, 4  ;;  %s1116_s1 = scalar_lea.hbm %s1558_s0, 8  ;;  %s1110_s13 = int_to_ptr.hbm [resolvable:$true] %s1109_s13 }
  0x3e   : > { %s1111_s21 = scalar_lea.hbm %s1110_s13, 4  ;;  %p1117_p13 = scmp.lt.s32.totalorder %s1110_s13, %s1558_s0 }
  0x3f   : > { %p1112_p5 = scmp.ne.s32.totalorder %s1110_s13, %s1111_s21  ;;  %p1118_p0 = scmp.lt.s32.totalorder %s1116_s1, %s1111_s21 }
  0x41   : > { %p1114_p7 = pnand %p1112_p5, %p1053_p8  ;;  %p1119_p2 = por %p1118_p0, %p1117_p13 }
  0x43   : > { %p1115_p10 = pneg %p1114_p7 }
  0x45   : > { %p1120_p4 = pnand %p1119_p2, %p1115_p10 }
  0x47   : > { %1123 = shalt.err (!%p1120_p4)
}
  0x48   : > { %991 = dma.hbm_to_vmem [thread:$0]  (!%p1357_p6), %s248_s28, 64, %s250_s3, %s238_s17  }
  0x49   : > { %s1139_s29 = sshra.s32 %s1391_s18, 4  ;;  %s1146_s21 = scalar_lea.hbm %s1560_s2, 128  ;;  %s1140_s29 = int_to_ptr.hbm [resolvable:$true] %s1139_s29 }
  0x4a   : > { %s1141_s12 = scalar_lea.hbm %s1140_s29, 64  ;;  %p1147_p4 = scmp.lt.s32.totalorder %s1140_s29, %s1560_s2 }
  0x4b   : > { %p1142_p5 = scmp.ne.s32.totalorder %s1140_s29, %s1141_s12  ;;  %p1148_p10 = scmp.lt.s32.totalorder %s1146_s21, %s1141_s12 }
  0x4d   : > { %p1144_p7 = pnand %p1142_p5, %p1053_p8  ;;  %p1149_p13 = por %p1148_p10, %p1147_p4 }
  0x4f   : > { %p1145_p3 = pneg %p1144_p7 }
  0x51   : > { %p1150_p0 = pnand %p1149_p13, %p1145_p3 }
  0x53   : > { %1153 = shalt.err (!%p1150_p0)
}
  0x54   : > { %997 = dma.hbm_to_vmem [thread:$0]  (!%p1357_p6), %s1391_s18, 1024, %s1393_s20, %s1367_s16, %s1590_s25, %s1590_s25, %s1589_s23  }
  0x55   : > { %302 = sbr.rel (%p1425_p1) target bundleno = 812 (0x32c), region = 40  ;;  %s1474_s3 = sand.u32 (!%p1425_p1), 1, %s1267_s22  }
  0x56   : > { %s836_s28 = sshll.u32 (!%p1425_p1), %s1474_s3, 2  ;;  %s305_s17 = scalar_lea.sflag (!%p1425_p1), [#allocation3], %s1474_s3 }
  0x57   : > { %s308_s8 = scalar_lea.vmem (!%p1425_p1), [#allocation2], %s836_s28 }
  0x5a   : > { %1242 = dma.done.wait (%p1405_p9), %s305_s17, 64  }
  0x5b   : > { %1244 = vsyncadd (%p1405_p9), %s305_s17, 4294967232  ;;  %s314_s23 = sand.u32 1, %s1396_s26   ;;  %s837_s25 = sshll.u32 %s1474_s3, 6 }
  0x5c   : > { %s315_s16 = scalar_lea.sflag [#allocation6], %s314_s23  ;;  %s318_s18 = scalar_lea.vmem [#allocation5], %s837_s25 }
  0x5d   : > { %1246 = dma.done.wait (%p1405_p9), %s315_s16, 2048  }
  0x5e   : > { %1248 = vsyncadd (%p1405_p9), %s315_s16, 4294965248  ;;  %s1490_s20 = scalar_lea.vmem [#allocation7], %s837_s25  ;;  %p1591_p6 = scmp.eq.s32.totalorder %s1396_s26, 0 }
  0x60   : > { %1250 = dma.done.wait (%p1591_p6), [#allocation9], 1024   ;;  %p1592_p8 = pmov %p1591_p6 }
  0x61   : > { %v953_v0 = vld [vmem:[%s318_s18 + $0x38] sm:$0xff]  ;;  %v952_v1 = vld [vmem:[%s318_s18 + $0x30] sm:$0xff]  ;;  %v951_v2 = vld [vmem:[%s318_s18 + $0x28] sm:$0xff]  ;;  %v473_v9 = vlaneseq  ;;  %s377_s7 = scalar_lea.vmem [#allocation11], %s836_s28  ;;  %s941_s14 = sshll.u32 %s1396_s26, 2 }
  0x62   : > { %1252 = vsyncadd (%p1592_p8), [#allocation9], 4294966272  ;;  %459 = vmatpush.bf16.xpose.msra.mxu0 %v953_v0  ;;  %v950_v3 = vld [vmem:[%s318_s18 + $0x20] sm:$0xff]  ;;  %v949_v4 = vld [vmem:[%s318_s18 + $0x18] sm:$0xff]  ;;  %s662_s27 = scalar_lea.hbm %s1564_s6, %s941_s14  ;;  %s664_s15 = sshll.u32 %s377_s7, 4  ;;  %s665_s15 = int_to_ptr.vmem [resolvable:$true] %s664_s15 }
  0x63   : > { %v948_v5 = vld [vmem:[%s318_s18 + $0x10] sm:$0xff]  ;;  %v947_v6 = vld [vmem:[%s318_s18 + $0x8] sm:$0xff]  ;;  %v946_v7 = vld [vmem:[%s318_s18] sm:$0xff]  ;;  %v474_v10 = vand.u32 127, %v473_v9  ;;  %s666_s29 = sshll.u32 %s662_s27, 4  ;;  %s638_s12 = scalar_lea.sflag [#allocation12], %s1474_s3  ;;  %s667_s29 = int_to_ptr.hbm [resolvable:$true] %s666_s29 }
  0x64   : > { %v378_v8 = vld [vmem:[%s308_s8] sm:$0xf]  ;;  %v960_v16 = vld [vmem:[%s1490_s20 + $0x30] sm:$0xff]  ;;  %v959_v17 = vld [vmem:[%s1490_s20 + $0x28] sm:$0xff]  ;;  %s1183_s19 = sshra.s32 %s667_s29, 4  ;;  %s1189_s11 = scalar_lea.hbm %s1564_s6, 8  ;;  %s1184_s19 = int_to_ptr.hbm [resolvable:$true] %s1183_s19 }
  0x65   : > { %vm475_vm0 = vcmp.lt.s32.totalorder %v474_v10, 8  ;;  %v961_v15 = vld [vmem:[%s1490_s20 + $0x38] sm:$0xff]  ;;  %v958_v18 = vld [vmem:[%s1490_s20 + $0x20] sm:$0xff]  ;;  %v956_v24 = vld [vmem:[%s1490_s20 + $0x10] sm:$0xff]  ;;  %s1185_s10 = scalar_lea.hbm %s1184_s19, 4  ;;  %p1190_p2 = scmp.lt.s32.totalorder %s1184_s19, %s1564_s6 }
  0x66   : > { %535 = vmatpush.bf16.msra.mxu1 %v961_v15  ;;  %v957_v19 = vld [vmem:[%s1490_s20 + $0x18] sm:$0xff]  ;;  %v955_v25 = vld [vmem:[%s1490_s20 + $0x8] sm:$0xff]  ;;  %v954_v26 = vld [vmem:[%s1490_s20] sm:$0xff]  ;;  %p1186_p3 = scmp.ne.s32.totalorder %s1184_s19, %s1185_s10  ;;  %p1191_p5 = scmp.lt.s32.totalorder %s1189_s11, %s1185_s10 }
  0x67   : > { %v969_v27 = vld [vmem:[#allocation8 + $0x38] sm:$0xff]  ;;  %v968_v28 = vld [vmem:[#allocation8 + $0x30] sm:$0xff]  ;;  %v967_v29 = vld [vmem:[#allocation8 + $0x28] sm:$0xff] }
  0x68   : > { %617 = vmatpush.bf16.msra.mxu2 %v969_v27  ;;  %v966_v30 = vld [vmem:[#allocation8 + $0x20] sm:$0xff]  ;;  %v965_v31 = vld [vmem:[#allocation8 + $0x18] sm:$0xff]  ;;  %v964_v32 = vld [vmem:[#allocation8 + $0x10] sm:$0xff]  ;;  %p1187_p9 = pnand %p1186_p3, %p1413_p11  ;;  %p1192_p7 = por %p1191_p5, %p1190_p2 }
  0x69   : > { %v963_v34 = vld [vmem:[#allocation8 + $0x8] sm:$0xff]  ;;  %v962_v38 = vld [vmem:[#allocation8] sm:$0xff] }
  0x6a   : > { %460 = vmatpush.bf16.xpose.msra.mxu0 %v952_v1  ;;  %536 = vmatpush.bf16.msra.mxu1 %v960_v16  ;;  %p1188_p1 = pneg %p1187_p9 }
  0x6c   : > { %618 = vmatpush.bf16.msra.mxu2 %v968_v28  ;;  %p1193_p4 = pnand %p1192_p7, %p1188_p1 }
  0x6e   : > { %537 = vmatpush.bf16.msra.mxu1 %v959_v17 }
  0x70   : > { %619 = vmatpush.bf16.msra.mxu2 %v967_v29 }
  0x72   : > { %461 = vmatpush.bf16.xpose.msra.mxu0 %v951_v2  ;;  %538 = vmatpush.bf16.msra.mxu1 %v958_v18 }
  0x74   : > { %620 = vmatpush.bf16.msra.mxu2 %v966_v30 }
  0x76   : > { %539 = vmatpush.bf16.msra.mxu1 %v957_v19 }
  0x78   : > { %621 = vmatpush.bf16.msra.mxu2 %v965_v31 }
  0x7a   : > { %462 = vmatpush.bf16.xpose.msra.mxu0 %v950_v3  ;;  %540 = vmatpush.bf16.msra.mxu1 %v956_v24 }
  0x7c   : > { %622 = vmatpush.bf16.msra.mxu2 %v964_v32 }
  0x7e   : > { %541 = vmatpush.bf16.msra.mxu1 %v955_v25 }
  0x80   : > { %623 = vmatpush.bf16.msra.mxu2 %v963_v34 }
  0x82   : > { %463 = vmatpush.bf16.xpose.msra.mxu0 %v949_v4  ;;  %542 = vmatpush.bf16.msra.mxu1 %v954_v26 }
  0x84   : > { %624 = vmatpush.bf16.msra.mxu2 %v962_v38 }
  0x8a   : > { %464 = vmatpush.bf16.xpose.msra.mxu0 %v948_v5 }
  0x92   : > { %465 = vmatpush.bf16.xpose.msra.mxu0 %v947_v6 }
  0x9a   : > { %466 = vmatpush.bf16.xpose.msra.mxu0 %v946_v7 }
  0xa1   : > { %467 = vmatmul.bf16.vlgmr.msra.gmra.mxu0 %v378_v8 }
 0x11e   : > { %v468_v11 = vpop.f32.mrf.mxu0 }
 0x11f   : > { %v472_v12 = vmul.f32 0.17677669, %v468_v11 }
 0x121   : > { %v476_v13 = vsel %vm475_vm0, %v472_v12, -1e+30 }
 0x122   : > { %477 = vmax.xlane.f32.xlu0 %v476_v13 }
 0x126   : > { %v470_v14 = vpop.f32.mrf.mxu0 }
 0x195   : > { %v478_v20 = vpop.xlane.xlu0 %477 }
 0x196   : > { %v479_v21 = vsub.f32 %v476_v13, %v478_v20 }
 0x198   : > { %v480_v22 = vmul.f32 1.442695, %v479_v21 }
 0x19a   : > { %1045 = vpow2.f32 %v480_v22 }
 0x1a0   : > { %v1046_v23 = vpop.eup %1045 }
 0x1a1   : > { %482 = vadd.xlane.f32.xlu0 %v1046_v23 }
 0x214   : > { %v483_v33 = vpop.xlane.xlu0 %482 }
 0x215   : > { %1047 = vrcp.f32 %v483_v33 }
 0x21b   : > { %v1048_v35 = vpop.eup %1047 }
 0x21c   : > { %v485_v36 = vmul.f32 %v1048_v35, %v1046_v23 }
 0x21e   : > { %v486_v37 = vpack.c.bf16 %v485_v36, %v485_v36 }
 0x220   : > { %543 = vmatmul.bf16.vlgmr.msra.gmra.mxu1 %v486_v37  ;;  %631 = vst [vmem:[%s377_s7] sm:$0xf] %v486_v37 }
 0x29d   : > { %v544_v39 = vpop.f32.mrf.mxu1 }
 0x29e   : > { %v548_v40 = vpack.c.bf16 %v544_v39, %v544_v39 }
 0x2a0   : > { %625 = vmatmul.bf16.vlgmr.msra.gmra.mxu2 %v548_v40 }
 0x2a5   : > { %v546_v41 = vpop.f32.mrf.mxu1 }
 0x2a6   : > { %1196 = shalt.err (!%p1193_p4)
}
 0x2a7   : > { %981 = dma.vmem_to_hbm [thread:$0]  (%p1413_p11), %s665_s15, 64, %s667_s29, %s638_s12   ;;  %v1044_v42 = vld [vmem:[%s1562_s4] ss:$0 sm:$0xff] }
 0x2a8   : > { %s940_s8 = sshll.u32 %s1396_s26, 3  ;;  %s840_s23 = sshll.u32 %s1474_s3, 3 }
 0x2a9   : > { %s648_s18 = scalar_lea.hbm %s1563_s5, %s940_s8  ;;  %s370_s14 = scalar_lea.vmem [#allocation10], %s840_s23 }
 0x2aa   : > { %s650_s30 = sshll.u32 %s370_s14, 4  ;;  %s652_s1 = sshll.u32 %s648_s18, 4  ;;  %s651_s30 = int_to_ptr.vmem [resolvable:$true] %s650_s30  ;;  %s653_s1 = int_to_ptr.hbm [resolvable:$true] %s652_s1 }
 0x2ab   : > { %s633_s27 = scalar_lea.sflag [#allocation4], %s1474_s3  ;;  %s1211_s26 = sshra.s32 %s653_s1, 4  ;;  %s1212_s26 = int_to_ptr.hbm [resolvable:$true] %s1211_s26 }
 0x2ac   : > { %s1213_s15 = scalar_lea.hbm %s1212_s26, 8  ;;  %s1217_s19 = scalar_lea.hbm %s1563_s5, 16 }
 0x2ad   : > { %p1214_p10 = scmp.ne.s32.totalorder %s1212_s26, %s1213_s15  ;;  %p1218_p6 = scmp.lt.s32.totalorder %s1212_s26, %s1563_s5 }
 0x2ae   : > { %p1219_p8 = scmp.lt.s32.totalorder %s1217_s19, %s1213_s15 }
 0x2af   : > { %p1215_p13 = pnand %p1214_p10, %p1413_p11 }
 0x2b0   : > { %p1220_p3 = por %p1219_p8, %p1218_p6 }
 0x2b1   : > { %p1216_p0 = pneg %p1215_p13 }
 0x2b3   : > { %p1221_p9 = pnand %p1220_p3, %p1216_p0 }
 0x323   : > { %v626_v43 = vpop.f32.mrf.mxu2 }
 0x324   : > { %v627_v44 = vadd.f32 %v1044_v42, %v626_v43 }
 0x326   : > { %630 = vst [vmem:[%s370_s14] sm:$0xff] %v627_v44 }
 0x327   : > { %1224 = shalt.err (!%p1221_p9)
}
 0x328   : > { %980 = dma.vmem_to_hbm [thread:$0]  (%p1413_p11), %s651_s30, 128, %s653_s1, %s633_s27  }
 0x32b   : > { %v628_v45 = vpop.f32.mrf.mxu2 }
 0x32c PF: > { %s1593_s3 = sld [smem:[#allocation18_spill]]  ;;  %p1595_p1 = scmp.ge.s32.totalorder %s1275_s24, 2 }
 0x32e   : > { %p999_p2 = pnand %p1595_p1, %p1417_p12 }
 0x330   : > { %p1000_p5 = pneg %p999_p2 }
 0x332   : > { %s678_s11 = sand.u32 1, %s1593_s3  }
 0x333   : > { %s679_s28 = scalar_lea.sflag [#allocation4], %s678_s11 }
 0x334   : > { %1254 = dma.done.wait (%p1000_p5), %s679_s28, 128  }
 0x335   : > { %1256 = vsyncadd (%p1000_p5), %s679_s28, 4294967168  ;;  %s689_s17 = scalar_lea.sflag [#allocation12], %s678_s11 }
 0x336   : > { %1258 = dma.done.wait (%p1000_p5), %s689_s17, 64  }
 0x337   : > { %1260 = vsyncadd (%p1000_p5), %s689_s17, 4294967232  ;;  %s1596_s24 = sld [smem:[#allocation20_spill]]  ;;  %s1599_s21 = smov %s1267_s22 }
 0x338   : > { %s1597_s9 = sld [smem:[#allocation19_spill]] }
 0x339   : > { %s1598_s23 = sld [smem:[#allocation21_spill]] }
 0x33d   : > { %p27_p11 = scmp.ge.s32.totalorder %s1596_s24, 4  }
 0x33e   : > { %s1600_s22 = smov %s1597_s9 }
 0x33f   :  { %29 = sbr.rel (!%p27_p11) target bundleno = 13 (0xd), region = 130 }
 0x344   :  { %695 = vsyncpa [#allocation3], 1 }
 0x345   :  { %697 = vsyncpa [#allocation3 + $0x1], 1 }
 0x346   :  { %698 = vsyncpa [#allocation6], 1 }
 0x347   :  { %700 = vsyncpa [#allocation6 + $0x1], 1 }
 0x348   :  { %701 = vsyncpa [#allocation9], 1 }
 0x349   :  { %702 = vsyncpa [#allocation4], 1 }
 0x34a   :  { %704 = vsyncpa [#allocation4 + $0x1], 1 }
 0x34b   :  { %705 = vsyncpa [#allocation12], 1 }
 0x34c   :  { %707 = vsyncpa [#allocation12 + $0x1], 1 }

</bundles_post_ra>
